<compile_context>
chip_gen: v7x
topology: tpu7x:2x2x1
jax: 0.10.0
libtpu: 0.0.40
codegen_flags: <defaults>
</compile_context>

<pallas_src>
import functools

import jax
import jax.numpy as jnp
from jax.experimental import pallas as pl
from jax.experimental.pallas import tpu as pltpu

LN_EPS = 1e-5  # torch.nn.LayerNorm default
LANE = 128
SUBLANE = 8


def _round_up(x, m):
    return (x + m - 1) // m * m


def _pad_feature_dim(d):
    """Lane-dense padding: multiples of 128; bump to 256 only when the extra
    padded FLOPs are small (v6e/v7x MXU is 2x256x256)."""
    d128 = _round_up(d, LANE)
    if d128 % 256 != 0 and d128 >= 1024:
        return _round_up(d, 256)
    return d128


def _vmem_capacity_bytes():
    try:
        cap = getattr(pltpu.get_tpu_info(), "vmem_capacity_bytes", None)
        if cap:
            return int(cap)
    except Exception:
        pass
    return 64 << 20  # conservative fallback (v7x per-TC VMEM)


def _make_fused_mlp_kernel(dims_real):
    """Whole (Linear->ReLU->LN->Dropout)* stack on one row tile; intermediate
    activations never leave VMEM/vregs."""
    num_layers = len(dims_real)

    def kernel(x_ref, *refs):
        o_ref = refs[-1]
        p = refs[:-1]  # (w0, aux0, w1, aux1, ...)
        y = x_ref[...].astype(jnp.float32)
        for li in range(num_layers):
            w = p[2 * li][...]          # bf16 [k, d_pad], zero-padded
            aux = p[2 * li + 1][...]    # f32 (3, d_pad): bias / gamma / beta
            d_real = dims_real[li]
            inv_d = 1.0 / float(d_real)

            # Linear on MXU: bf16 operands, f32 accumulation. Bias + ReLU.
            y = jnp.dot(y.astype(jnp.bfloat16), w,
                        preferred_element_type=jnp.float32)
            y = jnp.maximum(y + aux[0:1, :], 0.0)

            # LayerNorm over the REAL feature count via two lane reductions.
            # Padded lanes of y are exactly 0 (zero weight columns, bias,
            # gamma, beta), so no lane mask is needed and they stay 0 after
            # the affine (gamma=beta=0 on padded lanes).
            s1 = jnp.sum(y, axis=-1, keepdims=True)
            s2 = jnp.sum(y * y, axis=-1, keepdims=True)
            mean = s1 * inv_d
            var = jnp.maximum(s2 * inv_d - mean * mean, 0.0)
            inv_std = jax.lax.rsqrt(var + LN_EPS)
            scale = aux[1:2, :] * inv_std
            y = y * scale + (aux[2:3, :] - mean * scale)
            # Dropout: identity (eval mode).
        o_ref[...] = y.astype(o_ref.dtype)

    return kernel


def pack_mlp_params(input_dim, params):
    """One-time padding/packing (hoisted out of the per-call jit path).

    Weights -> bf16 [k, d_pad] (layer 0 keeps the REAL input_dim rows so x
    never needs feature padding); bias/gamma/beta -> one f32 (3, d_pad) block.
    Returns (flat_params, dims_real).
    """
    flat, dims_real = [], []
    prev_real = prev_pad = int(input_dim)
    for (w, b, gamma, beta) in params:
        d_real = int(w.shape[1])
        d_pad = _pad_feature_dim(d_real)
        w_p = jnp.pad(
            w.astype(jnp.float32),
            ((0, prev_pad - prev_real), (0, d_pad - d_real)),
        ).astype(jnp.bfloat16)
        aux = jnp.stack([
            jnp.pad(b.reshape(-1).astype(jnp.float32), (0, d_pad - d_real)),
            jnp.pad(gamma.reshape(-1).astype(jnp.float32), (0, d_pad - d_real)),
            jnp.pad(beta.reshape(-1).astype(jnp.float32), (0, d_pad - d_real)),
        ])
        flat += [w_p, aux]
        dims_real.append(d_real)
        prev_real, prev_pad = d_real, d_pad
    return tuple(flat), tuple(dims_real)


def _invariant_spec(shape, single_buffer):
    """BlockSpec for a grid-invariant parameter block (index_map constant)."""
    if single_buffer:
        try:
            return pl.BlockSpec(shape, lambda i: (0, 0),
                                pipeline_mode=pl.Buffered(1))
        except Exception:
            pass  # pipeline_mode / Buffered(1) unsupported -> default buffering
    return pl.BlockSpec(shape, lambda i: (0, 0))


@functools.partial(jax.jit, static_argnums=(2, 3, 4))
def _mlp_forward_impl(x, flat_params, dims_real, max_tm, single_buffer_params):
    n, d_in = x.shape
    num_layers = len(dims_real)
    dims_pad = tuple(int(flat_params[2 * i].shape[1]) for i in range(num_layers))
    d_out_pad = dims_pad[-1]

    # Row tile: large (amortizes per-step overhead + LN epilogue), 8-aligned.
    tm = min(max_tm, _round_up(n, SUBLANE))
    grid = (pl.cdiv(n, tm),)  # partial tail tile rows are discarded on store

    # x block keeps the full (real) feature dim -> no wrapper-side padding.
    in_specs = [pl.BlockSpec((tm, d_in), lambda i: (i, 0))]
    for li in range(num_layers):
        w_shape = tuple(int(s) for s in flat_params[2 * li].shape)
        in_specs.append(_invariant_spec(w_shape, single_buffer_params))
        in_specs.append(_invariant_spec((3, dims_pad[li]), single_buffer_params))

    # ---- VMEM budget & cost estimate -------------------------------------
    param_buf = 1 if single_buffer_params else 2
    param_bytes = 0
    flops = 0
    for li in range(num_layers):
        k, dp = (int(s) for s in flat_params[2 * li].shape)
        param_bytes += param_buf * (k * dp * 2 + SUBLANE * dp * 4)  # bf16 w + f32 aux
        flops += 2 * n * k * dp
    max_d = max(dims_pad + (_round_up(d_in, LANE),))
    act_bytes = (2 * tm * _round_up(d_in, LANE) + 2 * tm * d_out_pad) * 4
    interm_bytes = 8 * tm * max_d * 4  # headroom for live f32 temporaries
    need = param_bytes + act_bytes + interm_bytes + (2 << 20)
    vmem_limit = int(min(int(0.85 * _vmem_capacity_bytes()),
                         max(need, 16 << 20)))

    cost = pl.CostEstimate(
        flops=int(flops),
        transcendentals=int(n * num_layers),  # one rsqrt per row per layer
        bytes_accessed=int(
            x.size * x.dtype.itemsize
            + sum(int(a.size) * a.dtype.itemsize for a in flat_params)
            + n * d_out_pad * x.dtype.itemsize),
    )

    out = pl.pallas_call(
        _make_fused_mlp_kernel(dims_real),
        out_shape=jax.ShapeDtypeStruct((n, d_out_pad), x.dtype),
        grid_spec=pltpu.PrefetchScalarGridSpec(
            num_scalar_prefetch=0,
            grid=grid,
            in_specs=in_specs,
            out_specs=pl.BlockSpec((tm, d_out_pad), lambda i: (i, 0)),
        ),
        compiler_params=pltpu.CompilerParams(
            dimension_semantics=("parallel",),  # row tiles shard across TCs
            vmem_limit_bytes=vmem_limit,
        ),
        cost_estimate=cost,
    )(x, *flat_params)

    return out[:, :dims_real[-1]]


def mlp_forward(x, packed, *, max_tm=512):
    """Fused forward for the whole MLP stack.

    x: [..., D_in] float array.  packed: output of pack_mlp_params.
    """
    flat_params, dims_real = packed
    lead = x.shape[:-1]
    x2 = x.reshape(-1, x.shape[-1])
    try:
        out = _mlp_forward_impl(x2, flat_params, dims_real, max_tm, True)
    except Exception:
        # Fallback if single-buffered (Buffered(1)) parameter specs are
        # rejected by this Pallas/Mosaic version.
        out = _mlp_forward_impl(x2, flat_params, dims_real, max_tm, False)
    return out.reshape(*lead, dims_real[-1])


def init_mlp_params(key, input_dim, mlp_dims, dtype=jnp.float32):
    """Deterministic parameter init mirroring the module's shapes.
    Weights stored as [D_in, D_out] (transposed vs torch's [out, in])."""
    params = []
    prev = input_dim
    for d in mlp_dims:
        key, kw, kb = jax.random.split(key, 3)
        bound = 1.0 / jnp.sqrt(prev)
        w = jax.random.uniform(kw, (prev, d), dtype, -bound, bound)
        b = jax.random.uniform(kb, (d,), dtype, -bound, bound)
        gamma = jnp.ones((d,), dtype)
        beta = jnp.zeros((d,), dtype)
        params.append((w, b, gamma, beta))
        prev = d
    return params


def _reference_forward(x, params, *, bf16_matmul=True):
    """Pure-JAX reference (optionally with bf16 matmul operands to match the
    kernel's MXU precision)."""
    y = x.astype(jnp.float32)
    for (w, b, gamma, beta) in params:
        if bf16_matmul:
            y = jnp.dot(y.astype(jnp.bfloat16), w.astype(jnp.bfloat16),
                        preferred_element_type=jnp.float32)
        else:
            y = jnp.dot(y, w.astype(jnp.float32))
        y = jnp.maximum(y + b.astype(jnp.float32), 0.0)
        mean = jnp.mean(y, axis=-1, keepdims=True)
        var = jnp.mean((y - mean) ** 2, axis=-1, keepdims=True)
        y = (y - mean) * jax.lax.rsqrt(var + LN_EPS)
        y = y * gamma.astype(jnp.float32) + beta.astype(jnp.float32)
    return y.astype(x.dtype)


if __name__ == "__main__":
    key = jax.random.PRNGKey(0)
    k_x, k_p = jax.random.split(key)

    batch, input_dim = 8, 32
    mlp_dims = [64, 32]

    x = jax.random.normal(k_x, (batch, input_dim), jnp.float32)
    params = init_mlp_params(k_p, input_dim, mlp_dims)
    packed = pack_mlp_params(input_dim, params)

    out = mlp_forward(x, packed)
    out = jax.block_until_ready(out)

    ref = _reference_forward(x, params, bf16_matmul=True)
    assert out.shape == (batch, mlp_dims[-1])
    assert jnp.allclose(out, ref, atol=2e-3, rtol=2e-3), "mismatch vs reference"

    print("KERNEL_OK")
</pallas_src>

<mosaic_0001>
module attributes {stable_mosaic.version = 11 : i64} {
  func.func @kernel(%arg0: i32, %arg1: memref<8x32xf32, #tpu.memory_space<vmem>>, %arg2: memref<32x128xbf16, #tpu.memory_space<vmem>>, %arg3: memref<3x128xf32, #tpu.memory_space<vmem>>, %arg4: memref<128x128xbf16, #tpu.memory_space<vmem>>, %arg5: memref<3x128xf32, #tpu.memory_space<vmem>>, %arg6: memref<8x128xf32, #tpu.memory_space<vmem>>) attributes {dimension_semantics = [#tpu.dimension_semantics<parallel>], iteration_bounds = array<i64: 1>, scalar_prefetch = 0 : i64, scratch_operands = 0 : i64, tpu.core_type = #tpu.core_type<tc>, window_params = [{transform_indices = @transform_0, window_bounds = array<i64: 8, 32>}, {pipeline_mode = #tpu.pipeline_mode<synchronous>, transform_indices = @transform_1, window_bounds = array<i64: 32, 128>}, {pipeline_mode = #tpu.pipeline_mode<synchronous>, transform_indices = @transform_2, window_bounds = array<i64: 3, 128>}, {pipeline_mode = #tpu.pipeline_mode<synchronous>, transform_indices = @transform_3, window_bounds = array<i64: 128, 128>}, {pipeline_mode = #tpu.pipeline_mode<synchronous>, transform_indices = @transform_4, window_bounds = array<i64: 3, 128>}, {transform_indices = @transform_5, window_bounds = array<i64: 8, 128>}]} {
    %c0 = arith.constant 0 : index
    %c0_0 = arith.constant 0 : index
    %0 = vector.load %arg1[%c0, %c0_0] : memref<8x32xf32, #tpu.memory_space<vmem>>, vector<8x32xf32>
    %c0_1 = arith.constant 0 : index
    %c0_2 = arith.constant 0 : index
    %1 = vector.load %arg2[%c0_1, %c0_2] : memref<32x128xbf16, #tpu.memory_space<vmem>>, vector<32x128xbf16>
    %c0_3 = arith.constant 0 : index
    %c0_4 = arith.constant 0 : index
    %2 = vector.load %arg3[%c0_3, %c0_4] : memref<3x128xf32, #tpu.memory_space<vmem>>, vector<3x128xf32>
    %3 = arith.truncf %0 : vector<8x32xf32> to vector<8x32xbf16>
    %cst = arith.constant dense<0.000000e+00> : vector<8x128xf32>
    %4 = tpu.matmul %3, %1, %cst {dimension_numbers = #tpu.dot_dimension_numbers<[1], [0], [0], [1], [0, 0, 1, 1], [], []>} : vector<8x32xbf16>, vector<32x128xbf16>, vector<8x128xf32> -> vector<8x128xf32>
    %5 = vector.extract_strided_slice %2 {offsets = [0, 0], sizes = [1, 128], strides = [1, 1]} : vector<3x128xf32> to vector<1x128xf32>
    %6 = vector.broadcast %5 : vector<1x128xf32> to vector<8x128xf32>
    %7 = arith.addf %4, %6 : vector<8x128xf32>
    %cst_5 = arith.constant 0.000000e+00 : f32
    %8 = vector.broadcast %cst_5 : f32 to vector<8x128xf32>
    %9 = arith.maximumf %7, %8 : vector<8x128xf32>
    %cst_6 = arith.constant dense<0.000000e+00> : vector<8xf32>
    %10 = vector.multi_reduction <add>, %9, %cst_6 [1] : vector<8x128xf32> to vector<8xf32>
    %11 = vector.shape_cast %10 : vector<8xf32> to vector<8x1xf32>
    %12 = arith.mulf %9, %9 : vector<8x128xf32>
    %cst_7 = arith.constant dense<0.000000e+00> : vector<8xf32>
    %13 = vector.multi_reduction <add>, %12, %cst_7 [1] : vector<8x128xf32> to vector<8xf32>
    %14 = vector.shape_cast %13 : vector<8xf32> to vector<8x1xf32>
    %cst_8 = arith.constant 1.562500e-02 : f32
    %15 = vector.broadcast %cst_8 : f32 to vector<8x1xf32>
    %16 = arith.mulf %11, %15 : vector<8x1xf32>
    %cst_9 = arith.constant 1.562500e-02 : f32
    %17 = vector.broadcast %cst_9 : f32 to vector<8x1xf32>
    %18 = arith.mulf %14, %17 : vector<8x1xf32>
    %19 = arith.mulf %16, %16 : vector<8x1xf32>
    %20 = arith.subf %18, %19 : vector<8x1xf32>
    %cst_10 = arith.constant 0.000000e+00 : f32
    %21 = vector.broadcast %cst_10 : f32 to vector<8x1xf32>
    %22 = arith.maximumf %20, %21 : vector<8x1xf32>
    %cst_11 = arith.constant 9.99999974E-6 : f32
    %23 = vector.broadcast %cst_11 : f32 to vector<8x1xf32>
    %24 = arith.addf %22, %23 : vector<8x1xf32>
    %25 = math.rsqrt %24 : vector<8x1xf32>
    %26 = vector.extract_strided_slice %2 {offsets = [1, 0], sizes = [1, 128], strides = [1, 1]} : vector<3x128xf32> to vector<1x128xf32>
    %27 = vector.broadcast %26 : vector<1x128xf32> to vector<8x128xf32>
    %28 = vector.broadcast %25 : vector<8x1xf32> to vector<8x128xf32>
    %29 = arith.mulf %27, %28 : vector<8x128xf32>
    %30 = arith.mulf %9, %29 : vector<8x128xf32>
    %31 = vector.extract_strided_slice %2 {offsets = [2, 0], sizes = [1, 128], strides = [1, 1]} : vector<3x128xf32> to vector<1x128xf32>
    %32 = vector.broadcast %16 : vector<8x1xf32> to vector<8x128xf32>
    %33 = arith.mulf %32, %29 : vector<8x128xf32>
    %34 = vector.broadcast %31 : vector<1x128xf32> to vector<8x128xf32>
    %35 = arith.subf %34, %33 : vector<8x128xf32>
    %36 = arith.addf %30, %35 : vector<8x128xf32>
    %c0_12 = arith.constant 0 : index
    %c0_13 = arith.constant 0 : index
    %37 = vector.load %arg4[%c0_12, %c0_13] : memref<128x128xbf16, #tpu.memory_space<vmem>>, vector<128x128xbf16>
    %c0_14 = arith.constant 0 : index
    %c0_15 = arith.constant 0 : index
    %38 = vector.load %arg5[%c0_14, %c0_15] : memref<3x128xf32, #tpu.memory_space<vmem>>, vector<3x128xf32>
    %39 = arith.truncf %36 : vector<8x128xf32> to vector<8x128xbf16>
    %cst_16 = arith.constant dense<0.000000e+00> : vector<8x128xf32>
    %40 = tpu.matmul %39, %37, %cst_16 {dimension_numbers = #tpu.dot_dimension_numbers<[1], [0], [0], [1], [0, 0, 1, 1], [], []>} : vector<8x128xbf16>, vector<128x128xbf16>, vector<8x128xf32> -> vector<8x128xf32>
    %41 = vector.extract_strided_slice %38 {offsets = [0, 0], sizes = [1, 128], strides = [1, 1]} : vector<3x128xf32> to vector<1x128xf32>
    %42 = vector.broadcast %41 : vector<1x128xf32> to vector<8x128xf32>
    %43 = arith.addf %40, %42 : vector<8x128xf32>
    %cst_17 = arith.constant 0.000000e+00 : f32
    %44 = vector.broadcast %cst_17 : f32 to vector<8x128xf32>
    %45 = arith.maximumf %43, %44 : vector<8x128xf32>
    %cst_18 = arith.constant dense<0.000000e+00> : vector<8xf32>
    %46 = vector.multi_reduction <add>, %45, %cst_18 [1] : vector<8x128xf32> to vector<8xf32>
    %47 = vector.shape_cast %46 : vector<8xf32> to vector<8x1xf32>
    %48 = arith.mulf %45, %45 : vector<8x128xf32>
    %cst_19 = arith.constant dense<0.000000e+00> : vector<8xf32>
    %49 = vector.multi_reduction <add>, %48, %cst_19 [1] : vector<8x128xf32> to vector<8xf32>
    %50 = vector.shape_cast %49 : vector<8xf32> to vector<8x1xf32>
    %cst_20 = arith.constant 3.125000e-02 : f32
    %51 = vector.broadcast %cst_20 : f32 to vector<8x1xf32>
    %52 = arith.mulf %47, %51 : vector<8x1xf32>
    %cst_21 = arith.constant 3.125000e-02 : f32
    %53 = vector.broadcast %cst_21 : f32 to vector<8x1xf32>
    %54 = arith.mulf %50, %53 : vector<8x1xf32>
    %55 = arith.mulf %52, %52 : vector<8x1xf32>
    %56 = arith.subf %54, %55 : vector<8x1xf32>
    %cst_22 = arith.constant 0.000000e+00 : f32
    %57 = vector.broadcast %cst_22 : f32 to vector<8x1xf32>
    %58 = arith.maximumf %56, %57 : vector<8x1xf32>
    %cst_23 = arith.constant 9.99999974E-6 : f32
    %59 = vector.broadcast %cst_23 : f32 to vector<8x1xf32>
    %60 = arith.addf %58, %59 : vector<8x1xf32>
    %61 = math.rsqrt %60 : vector<8x1xf32>
    %62 = vector.extract_strided_slice %38 {offsets = [1, 0], sizes = [1, 128], strides = [1, 1]} : vector<3x128xf32> to vector<1x128xf32>
    %63 = vector.broadcast %62 : vector<1x128xf32> to vector<8x128xf32>
    %64 = vector.broadcast %61 : vector<8x1xf32> to vector<8x128xf32>
    %65 = arith.mulf %63, %64 : vector<8x128xf32>
    %66 = arith.mulf %45, %65 : vector<8x128xf32>
    %67 = vector.extract_strided_slice %38 {offsets = [2, 0], sizes = [1, 128], strides = [1, 1]} : vector<3x128xf32> to vector<1x128xf32>
    %68 = vector.broadcast %52 : vector<8x1xf32> to vector<8x128xf32>
    %69 = arith.mulf %68, %65 : vector<8x128xf32>
    %70 = vector.broadcast %67 : vector<1x128xf32> to vector<8x128xf32>
    %71 = arith.subf %70, %69 : vector<8x128xf32>
    %72 = arith.addf %66, %71 : vector<8x128xf32>
    %c0_24 = arith.constant 0 : index
    %c0_25 = arith.constant 0 : index
    %73 = vector.load %arg6[%c0_24, %c0_25] : memref<8x128xf32, #tpu.memory_space<vmem>>, vector<8x128xf32>
    tpu.vector_store %arg6[%c0_24, %c0_25], %72 {strides = array<i32>} : memref<8x128xf32, #tpu.memory_space<vmem>>, vector<8x128xf32>,
    return
  }
  func.func @transform_0(%arg0: i32) -> (i32, i32) {
    %c0_i32 = arith.constant 0 : i32
    %c0_i32_0 = arith.constant 0 : i32
    return %arg0, %c0_i32 : i32, i32
  }
  func.func @transform_1(%arg0: i32) -> (i32, i32) {
    %c0_i32 = arith.constant 0 : i32
    %c0_i32_0 = arith.constant 0 : i32
    %c0_i32_1 = arith.constant 0 : i32
    return %c0_i32, %c0_i32_0 : i32, i32
  }
  func.func @transform_2(%arg0: i32) -> (i32, i32) {
    %c0_i32 = arith.constant 0 : i32
    %c0_i32_0 = arith.constant 0 : i32
    %c0_i32_1 = arith.constant 0 : i32
    return %c0_i32, %c0_i32_0 : i32, i32
  }
  func.func @transform_3(%arg0: i32) -> (i32, i32) {
    %c0_i32 = arith.constant 0 : i32
    %c0_i32_0 = arith.constant 0 : i32
    %c0_i32_1 = arith.constant 0 : i32
    return %c0_i32, %c0_i32_0 : i32, i32
  }
  func.func @transform_4(%arg0: i32) -> (i32, i32) {
    %c0_i32 = arith.constant 0 : i32
    %c0_i32_0 = arith.constant 0 : i32
    %c0_i32_1 = arith.constant 0 : i32
    return %c0_i32, %c0_i32_0 : i32, i32
  }
  func.func @transform_5(%arg0: i32) -> (i32, i32) {
    %c0_i32 = arith.constant 0 : i32
    %c0_i32_0 = arith.constant 0 : i32
    return %arg0, %c0_i32 : i32, i32
  }
}

module attributes {stable_mosaic.version = 11 : i64} {
  func.func @kernel(%arg0: i32, %arg1: memref<8x32xf32, #tpu.memory_space<vmem>>, %arg2: memref<32x128xbf16, #tpu.memory_space<vmem>>, %arg3: memref<3x128xf32, #tpu.memory_space<vmem>>, %arg4: memref<128x128xbf16, #tpu.memory_space<vmem>>, %arg5: memref<3x128xf32, #tpu.memory_space<vmem>>, %arg6: memref<8x128xf32, #tpu.memory_space<vmem>>) attributes {dimension_semantics = [#tpu.dimension_semantics<parallel>], iteration_bounds = array<i64: 1>, scalar_prefetch = 0 : i64, scratch_operands = 0 : i64, tpu.core_type = #tpu.core_type<tc>, window_params = [{transform_indices = @transform_0, window_bounds = array<i64: 8, 32>}, {pipeline_mode = #tpu.pipeline_mode<synchronous>, transform_indices = @transform_1, window_bounds = array<i64: 32, 128>}, {pipeline_mode = #tpu.pipeline_mode<synchronous>, transform_indices = @transform_2, window_bounds = array<i64: 3, 128>}, {pipeline_mode = #tpu.pipeline_mode<synchronous>, transform_indices = @transform_3, window_bounds = array<i64: 128, 128>}, {pipeline_mode = #tpu.pipeline_mode<synchronous>, transform_indices = @transform_4, window_bounds = array<i64: 3, 128>}, {transform_indices = @transform_5, window_bounds = array<i64: 8, 128>}]} {
    %c0 = arith.constant 0 : index
    %c0_0 = arith.constant 0 : index
    %0 = vector.load %arg1[%c0, %c0_0] : memref<8x32xf32, #tpu.memory_space<vmem>>, vector<8x32xf32>
    %c0_1 = arith.constant 0 : index
    %c0_2 = arith.constant 0 : index
    %1 = vector.load %arg2[%c0_1, %c0_2] : memref<32x128xbf16, #tpu.memory_space<vmem>>, vector<32x128xbf16>
    %c0_3 = arith.constant 0 : index
    %c0_4 = arith.constant 0 : index
    %2 = vector.load %arg3[%c0_3, %c0_4] : memref<3x128xf32, #tpu.memory_space<vmem>>, vector<3x128xf32>
    %3 = arith.truncf %0 : vector<8x32xf32> to vector<8x32xbf16>
    %cst = arith.constant dense<0.000000e+00> : vector<8x128xf32>
    %4 = tpu.matmul %3, %1, %cst {dimension_numbers = #tpu.dot_dimension_numbers<[1], [0], [0], [1], [0, 0, 1, 1], [], []>} : vector<8x32xbf16>, vector<32x128xbf16>, vector<8x128xf32> -> vector<8x128xf32>
    %5 = vector.extract_strided_slice %2 {offsets = [0, 0], sizes = [1, 128], strides = [1, 1]} : vector<3x128xf32> to vector<1x128xf32>
    %6 = vector.broadcast %5 : vector<1x128xf32> to vector<8x128xf32>
    %7 = arith.addf %4, %6 : vector<8x128xf32>
    %cst_5 = arith.constant 0.000000e+00 : f32
    %8 = vector.broadcast %cst_5 : f32 to vector<8x128xf32>
    %9 = arith.maximumf %7, %8 : vector<8x128xf32>
    %cst_6 = arith.constant dense<0.000000e+00> : vector<8xf32>
    %10 = vector.multi_reduction <add>, %9, %cst_6 [1] : vector<8x128xf32> to vector<8xf32>
    %11 = vector.shape_cast %10 : vector<8xf32> to vector<8x1xf32>
    %12 = arith.mulf %9, %9 : vector<8x128xf32>
    %cst_7 = arith.constant dense<0.000000e+00> : vector<8xf32>
    %13 = vector.multi_reduction <add>, %12, %cst_7 [1] : vector<8x128xf32> to vector<8xf32>
    %14 = vector.shape_cast %13 : vector<8xf32> to vector<8x1xf32>
    %cst_8 = arith.constant 1.562500e-02 : f32
    %15 = vector.broadcast %cst_8 : f32 to vector<8x1xf32>
    %16 = arith.mulf %11, %15 : vector<8x1xf32>
    %cst_9 = arith.constant 1.562500e-02 : f32
    %17 = vector.broadcast %cst_9 : f32 to vector<8x1xf32>
    %18 = arith.mulf %14, %17 : vector<8x1xf32>
    %19 = arith.mulf %16, %16 : vector<8x1xf32>
    %20 = arith.subf %18, %19 : vector<8x1xf32>
    %cst_10 = arith.constant 0.000000e+00 : f32
    %21 = vector.broadcast %cst_10 : f32 to vector<8x1xf32>
    %22 = arith.maximumf %20, %21 : vector<8x1xf32>
    %cst_11 = arith.constant 9.99999974E-6 : f32
    %23 = vector.broadcast %cst_11 : f32 to vector<8x1xf32>
    %24 = arith.addf %22, %23 : vector<8x1xf32>
    %25 = math.rsqrt %24 : vector<8x1xf32>
    %26 = vector.extract_strided_slice %2 {offsets = [1, 0], sizes = [1, 128], strides = [1, 1]} : vector<3x128xf32> to vector<1x128xf32>
    %27 = vector.broadcast %26 : vector<1x128xf32> to vector<8x128xf32>
    %28 = vector.broadcast %25 : vector<8x1xf32> to vector<8x128xf32>
    %29 = arith.mulf %27, %28 : vector<8x128xf32>
    %30 = arith.mulf %9, %29 : vector<8x128xf32>
    %31 = vector.extract_strided_slice %2 {offsets = [2, 0], sizes = [1, 128], strides = [1, 1]} : vector<3x128xf32> to vector<1x128xf32>
    %32 = vector.broadcast %16 : vector<8x1xf32> to vector<8x128xf32>
    %33 = arith.mulf %32, %29 : vector<8x128xf32>
    %34 = vector.broadcast %31 : vector<1x128xf32> to vector<8x128xf32>
    %35 = arith.subf %34, %33 : vector<8x128xf32>
    %36 = arith.addf %30, %35 : vector<8x128xf32>
    %c0_12 = arith.constant 0 : index
    %c0_13 = arith.constant 0 : index
    %37 = vector.load %arg4[%c0_12, %c0_13] : memref<128x128xbf16, #tpu.memory_space<vmem>>, vector<128x128xbf16>
    %c0_14 = arith.constant 0 : index
    %c0_15 = arith.constant 0 : index
    %38 = vector.load %arg5[%c0_14, %c0_15] : memref<3x128xf32, #tpu.memory_space<vmem>>, vector<3x128xf32>
    %39 = arith.truncf %36 : vector<8x128xf32> to vector<8x128xbf16>
    %cst_16 = arith.constant dense<0.000000e+00> : vector<8x128xf32>
    %40 = tpu.matmul %39, %37, %cst_16 {dimension_numbers = #tpu.dot_dimension_numbers<[1], [0], [0], [1], [0, 0, 1, 1], [], []>} : vector<8x128xbf16>, vector<128x128xbf16>, vector<8x128xf32> -> vector<8x128xf32>
    %41 = vector.extract_strided_slice %38 {offsets = [0, 0], sizes = [1, 128], strides = [1, 1]} : vector<3x128xf32> to vector<1x128xf32>
    %42 = vector.broadcast %41 : vector<1x128xf32> to vector<8x128xf32>
    %43 = arith.addf %40, %42 : vector<8x128xf32>
    %cst_17 = arith.constant 0.000000e+00 : f32
    %44 = vector.broadcast %cst_17 : f32 to vector<8x128xf32>
    %45 = arith.maximumf %43, %44 : vector<8x128xf32>
    %cst_18 = arith.constant dense<0.000000e+00> : vector<8xf32>
    %46 = vector.multi_reduction <add>, %45, %cst_18 [1] : vector<8x128xf32> to vector<8xf32>
    %47 = vector.shape_cast %46 : vector<8xf32> to vector<8x1xf32>
    %48 = arith.mulf %45, %45 : vector<8x128xf32>
    %cst_19 = arith.constant dense<0.000000e+00> : vector<8xf32>
    %49 = vector.multi_reduction <add>, %48, %cst_19 [1] : vector<8x128xf32> to vector<8xf32>
    %50 = vector.shape_cast %49 : vector<8xf32> to vector<8x1xf32>
    %cst_20 = arith.constant 3.125000e-02 : f32
    %51 = vector.broadcast %cst_20 : f32 to vector<8x1xf32>
    %52 = arith.mulf %47, %51 : vector<8x1xf32>
    %cst_21 = arith.constant 3.125000e-02 : f32
    %53 = vector.broadcast %cst_21 : f32 to vector<8x1xf32>
    %54 = arith.mulf %50, %53 : vector<8x1xf32>
    %55 = arith.mulf %52, %52 : vector<8x1xf32>
    %56 = arith.subf %54, %55 : vector<8x1xf32>
    %cst_22 = arith.constant 0.000000e+00 : f32
    %57 = vector.broadcast %cst_22 : f32 to vector<8x1xf32>
    %58 = arith.maximumf %56, %57 : vector<8x1xf32>
    %cst_23 = arith.constant 9.99999974E-6 : f32
    %59 = vector.broadcast %cst_23 : f32 to vector<8x1xf32>
    %60 = arith.addf %58, %59 : vector<8x1xf32>
    %61 = math.rsqrt %60 : vector<8x1xf32>
    %62 = vector.extract_strided_slice %38 {offsets = [1, 0], sizes = [1, 128], strides = [1, 1]} : vector<3x128xf32> to vector<1x128xf32>
    %63 = vector.broadcast %62 : vector<1x128xf32> to vector<8x128xf32>
    %64 = vector.broadcast %61 : vector<8x1xf32> to vector<8x128xf32>
    %65 = arith.mulf %63, %64 : vector<8x128xf32>
    %66 = arith.mulf %45, %65 : vector<8x128xf32>
    %67 = vector.extract_strided_slice %38 {offsets = [2, 0], sizes = [1, 128], strides = [1, 1]} : vector<3x128xf32> to vector<1x128xf32>
    %68 = vector.broadcast %52 : vector<8x1xf32> to vector<8x128xf32>
    %69 = arith.mulf %68, %65 : vector<8x128xf32>
    %70 = vector.broadcast %67 : vector<1x128xf32> to vector<8x128xf32>
    %71 = arith.subf %70, %69 : vector<8x128xf32>
    %72 = arith.addf %66, %71 : vector<8x128xf32>
    %c0_24 = arith.constant 0 : index
    %c0_25 = arith.constant 0 : index
    %73 = vector.load %arg6[%c0_24, %c0_25] : memref<8x128xf32, #tpu.memory_space<vmem>>, vector<8x128xf32>
    tpu.vector_store %arg6[%c0_24, %c0_25], %72 {strides = array<i32>} : memref<8x128xf32, #tpu.memory_space<vmem>>, vector<8x128xf32>,
    return
  }
  func.func @transform_0(%arg0: i32) -> (i32, i32) {
    %c0_i32 = arith.constant 0 : i32
    %c0_i32_0 = arith.constant 0 : i32
    return %arg0, %c0_i32 : i32, i32
  }
  func.func @transform_1(%arg0: i32) -> (i32, i32) {
    %c0_i32 = arith.constant 0 : i32
    %c0_i32_0 = arith.constant 0 : i32
    %c0_i32_1 = arith.constant 0 : i32
    return %c0_i32, %c0_i32_0 : i32, i32
  }
  func.func @transform_2(%arg0: i32) -> (i32, i32) {
    %c0_i32 = arith.constant 0 : i32
    %c0_i32_0 = arith.constant 0 : i32
    %c0_i32_1 = arith.constant 0 : i32
    return %c0_i32, %c0_i32_0 : i32, i32
  }
  func.func @transform_3(%arg0: i32) -> (i32, i32) {
    %c0_i32 = arith.constant 0 : i32
    %c0_i32_0 = arith.constant 0 : i32
    %c0_i32_1 = arith.constant 0 : i32
    return %c0_i32, %c0_i32_0 : i32, i32
  }
  func.func @transform_4(%arg0: i32) -> (i32, i32) {
    %c0_i32 = arith.constant 0 : i32
    %c0_i32_0 = arith.constant 0 : i32
    %c0_i32_1 = arith.constant 0 : i32
    return %c0_i32, %c0_i32_0 : i32, i32
  }
  func.func @transform_5(%arg0: i32) -> (i32, i32) {
    %c0_i32 = arith.constant 0 : i32
    %c0_i32_0 = arith.constant 0 : i32
    return %arg0, %c0_i32 : i32, i32
  }
}

</mosaic_0001>

<bundles_post_ra>
// kernel: _mlp_forward_impl.1
= control target key start
LH: loop header
LB: loop body
LE: loop exit
PB: predicated region body
PF: predicated region fallthrough
CT: control target
= control target key end

     0   :  { %10 = vsyncpa [#allocation3], 0  ;;  %s577_s0 = inlined_call_operand.hbm [shape: f32[8,32], index: 0, kind: input, shape index: {}]   ;;  %s578_s1 = inlined_call_operand.hbm [shape: bf16[32,128], index: 1, kind: input, shape index: {}]   ;;  %s579_s2 = inlined_call_operand.vmem [shape: f32[3,128], index: 2, kind: input, shape index: {}]   ;;  %s580_s3 = inlined_call_operand.hbm [shape: bf16[128,128], index: 3, kind: input, shape index: {}]   ;;  %s581_s4 = inlined_call_operand.vmem [shape: f32[3,128], index: 4, kind: input, shape index: {}]   ;;  %s582_s5 = inlined_call_operand.hbm [shape: f32[8,128], index: 5, kind: output, shape index: {}]  }
   0x1   :  { %11 = vsyncpa [#allocation6], 0 }
   0x2   :  { %12 = vsyncpa [#allocation4], 0  ;;  %s474_s18 = smov [#allocation5]   ;;  %s380_s22 = scalar_lea.hbm %s578_s1, 256 }
   0x3   :  { %s28_s19 = sshll.u32 %s474_s18, 4  ;;  %p381_p0 = scmp.ne.s32.totalorder %s578_s1, %s380_s22  ;;  %s29_s19 = int_to_ptr.vmem [resolvable:$true] %s28_s19 }
   0x4   :  { %p384_p1 = scmp.lt.u32.totalorder %s380_s22, %s578_s1 }
   0x6   :  { %p386_p2 = pnand %p384_p1, %p381_p0 }
   0x8   :  { %389 = shalt.err (!%p386_p2)
}
   0x9   :  { %s390_s27 = scalar_lea.vmem %s29_s19, 256  ;;  %p395_p4 = scmp.lt.s32.totalorder %s29_s19, %s29_s19 }
   0xa   :  { %p391_p3 = scmp.ne.s32.totalorder %s29_s19, %s390_s27  ;;  %p396_p5 = scmp.lt.s32.totalorder %s390_s27, %s390_s27 }
   0xc   :  { %p397_p6 = por %p396_p5, %p395_p4 }
   0xe   :  { %p398_p7 = pnand %p397_p6, %p391_p3 }
  0x10   :  { %401 = shalt.err (!%p398_p7)
}
  0x11   :  { %s475_s28 = smov 64   ;;  %s476_s29 = smov 4  }
  0x12   :  { %34 = dma.hbm_to_vmem [thread:$0]  %s578_s1, 256, %s29_s19, [#allocation6], %s475_s28, %s475_s28, %s476_s29  }
  0x13   :  { %s477_s7 = smov [#allocation2]   ;;  %s478_s9 = smov [#allocation7]  }
  0x14   :  { %s19_s8 = sshll.u32 %s477_s7, 4  ;;  %s42_s10 = sshll.u32 %s478_s9, 4  ;;  %s20_s8 = int_to_ptr.vmem [resolvable:$true] %s19_s8  ;;  %s43_s10 = int_to_ptr.vmem [resolvable:$true] %s42_s10 }
  0x15   :  { %s402_s13 = scalar_lea.hbm %s577_s0, 128 }
  0x16   :  { %p403_p8 = scmp.ne.s32.totalorder %s577_s0, %s402_s13  ;;  %p406_p9 = scmp.lt.u32.totalorder %s402_s13, %s577_s0 }
  0x18   :  { %p408_p10 = pnand %p406_p9, %p403_p8 }
  0x1a   :  { %411 = shalt.err (!%p408_p10)
}
  0x1b   :  { %s412_s1 = scalar_lea.vmem %s20_s8, 128  ;;  %p417_p12 = scmp.lt.s32.totalorder %s20_s8, %s20_s8 }
  0x1c   :  { %p413_p11 = scmp.ne.s32.totalorder %s20_s8, %s412_s1  ;;  %p418_p13 = scmp.lt.s32.totalorder %s412_s1, %s412_s1 }
  0x1e   :  { %p419_p0 = por %p418_p13, %p417_p12 }
  0x20   :  { %p420_p1 = pnand %p419_p0, %p413_p11 }
  0x22   :  { %423 = shalt.err (!%p420_p1)
}
  0x23   :  { %22 = dma.hbm_to_vmem [thread:$0]  %s577_s0, 128, %s20_s8, [#allocation3]  }
  0x24   :  { %s424_s22 = scalar_lea.hbm %s580_s3, 1024 }
  0x25   :  { %p425_p2 = scmp.ne.s32.totalorder %s580_s3, %s424_s22  ;;  %p428_p3 = scmp.lt.u32.totalorder %s424_s22, %s580_s3 }
  0x27   :  { %p430_p4 = pnand %p428_p3, %p425_p2 }
  0x29   :  { %433 = shalt.err (!%p430_p4)
}
  0x2a   :  { %s434_s27 = scalar_lea.vmem %s43_s10, 1024  ;;  %p439_p6 = scmp.lt.s32.totalorder %s43_s10, %s43_s10 }
  0x2b   :  { %p435_p5 = scmp.ne.s32.totalorder %s43_s10, %s434_s27  ;;  %p440_p7 = scmp.lt.s32.totalorder %s434_s27, %s434_s27 }
  0x2d   :  { %p441_p8 = por %p440_p7, %p439_p6 }
  0x2f   :  { %p442_p9 = pnand %p441_p8, %p435_p5 }
  0x31   :  { %445 = shalt.err (!%p442_p9)
}
  0x32   :  { %48 = dma.hbm_to_vmem [thread:$0]  %s580_s3, 1024, %s43_s10, [#allocation6], %s475_s28, %s475_s28, %s476_s29  }
  0x33   :  { %468 = dma.done.wait [#allocation3], 128  }
  0x34   :  { %469 = vsyncadd [#allocation3], 4294967168 }
  0x35   :  { %470 = dma.done.wait [#allocation6], 1280  }
  0x36   :  { %471 = vsyncadd [#allocation6], 4294966016  ;;  %v479_v0 = vmov 0.0   ;;  %vm480_vm0 = vmmov 0   ;;  %v366_v1 = vld [vmem:[#allocation5] sm:$0xff]   ;;  %v367_v2 = vld [vmem:[#allocation5 + $0x8] sm:$0xff]   ;;  %v68_v5 = vlaneseq }
  0x37   :  { %330 = vmatprep.subr.bf16.mxu0 %v479_v0  ;;  %334 = vmatprep.mubr.msk.bf16.mxu0 %vm480_vm0, %v479_v0  ;;  %v61_v3 = vld [vmem:[#allocation2] sm:$0xff]  ;;  %vm84_vm1 = vcmask 261120   ;;  %v368_v17 = vld [vmem:[#allocation7] sm:$0xff]   ;;  %v370_v19 = vld [vmem:[#allocation7 + $0x10] sm:$0xff]  }
  0x38   :  { %338 = vmatprep.subr.bf16.mxu1 %v479_v0  ;;  %354 = vmatprep.mubr.msk.bf16.mxu1 %vm480_vm0, %v479_v0  ;;  %v67_v4 = vpack.c.bf16 %v61_v3, %v61_v3  ;;  %v554_v6 = vshrl.u32 %v68_v5, 7  ;;  %v66_v8 = vld [vmem:[%s579_s2] sm:$0x7]  ;;  %v371_v20 = vld [vmem:[#allocation7 + $0x18] sm:$0xff]   ;;  %v372_v21 = vld [vmem:[#allocation7 + $0x20] sm:$0xff]  }
  0x39   :  { %331 = vmatpush3.bf16.msra.mxu0 %v366_v1  ;;  %339 = vmatpush3.bf16.msra.mxu1 %v368_v17  ;;  %v369_v18 = vld [vmem:[#allocation7 + $0x8] sm:$0xff]   ;;  %v374_v23 = vld [vmem:[#allocation7 + $0x30] sm:$0xff]   ;;  %v375_v24 = vld [vmem:[#allocation7 + $0x38] sm:$0xff]  }
  0x3a   :  { %332 = vmatprep.subr.bf16.mxu0 %v479_v0  ;;  %v70_v7 = vsub.s32 0, %v554_v6  ;;  %340 = vmatprep.subr.bf16.mxu1 %v479_v0  ;;  %v373_v22 = vld [vmem:[#allocation7 + $0x28] sm:$0xff]   ;;  %v143_v33 = vsub.s32 1, %v554_v6  ;;  %v150_v35 = vsub.s32 2, %v554_v6 }
  0x3b   :  { %v170_v44 = vld [vmem:[%s581_s4] sm:$0x7]  ;;  %s481_s4 = smov [#allocation8]  }
  0x3c   :  { %v71_v9 = vrot.slane %v66_v8, %v70_v7  ;;  %v144_v34 = vrot.slane %v66_v8, %v143_v33  ;;  %v151_v37 = vrot.slane %v66_v8, %v150_v35  ;;  %v175_v45 = vrot.slane %v170_v44, %v70_v7  ;;  %s297_s6 = sshll.u32 %s481_s4, 4  ;;  %s298_s6 = int_to_ptr.vmem [resolvable:$true] %s297_s6 }
  0x3d   :  { %333 = vmatpush3.bf16.msra.mxu0 %v367_v2  ;;  %341 = vmatpush3.bf16.msra.mxu1 %v369_v18  ;;  %v280_v61 = vrot.slane %v170_v44, %v143_v33  ;;  %v287_v63 = vrot.slane %v170_v44, %v150_v35  ;;  %s446_s7 = scalar_lea.vmem %s298_s6, 128  ;;  %p451_p11 = scmp.lt.s32.totalorder %s298_s6, %s298_s6 }
  0x3e   :  { %342 = vmatprep.subr.bf16.mxu1 %v479_v0  ;;  %p447_p10 = scmp.ne.s32.totalorder %s298_s6, %s446_s7  ;;  %p452_p12 = scmp.lt.s32.totalorder %s446_s7, %s446_s7 }
  0x40   :  { %335 = vmatmul.mubr.msk.bf16.vlgmr.msra.gmra.mrb[0].mxu0 %vm84_vm1, %v67_v4  ;;  %p453_p13 = por %p452_p12, %p451_p11 }
  0x41   :  { %343 = vmatpush3.bf16.msra.mxu1 %v370_v19 }
  0x42   :  { %344 = vmatprep.subr.bf16.mxu1 %v479_v0  ;;  %p454_p0 = pnand %p453_p13, %p447_p10 }
  0x45   :  { %345 = vmatpush3.bf16.msra.mxu1 %v371_v20 }
  0x46   :  { %346 = vmatprep.subr.bf16.mxu1 %v479_v0 }
  0x49   :  { %347 = vmatpush3.bf16.msra.mxu1 %v372_v21 }
  0x4a   :  { %348 = vmatprep.subr.bf16.mxu1 %v479_v0 }
  0x4d   :  { %349 = vmatpush3.bf16.msra.mxu1 %v373_v22 }
  0x4e   :  { %350 = vmatprep.subr.bf16.mxu1 %v479_v0 }
  0x51   :  { %351 = vmatpush3.bf16.msra.mxu1 %v374_v23 }
  0x52   :  { %352 = vmatprep.subr.bf16.mxu1 %v479_v0 }
  0x55   :  { %353 = vmatpush3.bf16.msra.mxu1 %v375_v24 }
 0x113   :  { %v122_v10 = vpop.f32.mrb[0].mxu0 }
 0x114   :  { %v123_v11 = vadd.f32 %v122_v10, %v71_v9  ;;  %v336_v12 = vpop.f32.mrb[1].mxu0 }
 0x115   :  { %v125_v13 = vpop.f32.mrb[2].mxu0 }
 0x116   :  { %v128_v14 = vmax.f32 %v123_v11, 0.0  ;;  %v337_v15 = vpop.f32.mrb[3].mxu0 }
 0x118   :  { %129 = vadd.xlane.f32.xlu0 %v128_v14  ;;  %v131_v16 = vmul.f32 %v128_v14, %v128_v14 }
 0x11c   :  { %132 = vadd.xlane.f32.xlu0 %v131_v16 }
 0x1a5   :  { %v130_v25 = vpop.xlane.xlu0 %129 }
 0x1a6   :  { %v134_v26 = vmul.f32 0.015625, %v130_v25 }
 0x1a8   :  { %v136_v28 = vmul.f32 %v134_v26, %v134_v26 }
 0x1a9   :  { %v133_v27 = vpop.xlane.xlu0 %132 }
 0x1aa   :  { %v135_v29 = vmul.f32 0.015625, %v133_v27 }
 0x1ac   :  { %v137_v30 = vsub.f32 %v135_v29, %v136_v28 }
 0x1ae   :  { %v138_v31 = vmax.f32 %v137_v30, 0.0 }
 0x1b0   :  { %v139_v32 = vadd.f32 1e-05, %v138_v31 }
 0x1b2   :  { %376 = vrsqrt.f32 %v139_v32 }
 0x1bc   :  { %v377_v36 = vpop.eup %376 }
 0x1bd   :  { %v145_v38 = vmul.f32 %v377_v36, %v144_v34 }
 0x1bf   :  { %v147_v39 = vmul.f32 %v145_v38, %v134_v26  ;;  %v146_v40 = vmul.f32 %v145_v38, %v128_v14 }
 0x1c1   :  { %v152_v41 = vsub.f32 %v151_v37, %v147_v39 }
 0x1c3   :  { %v153_v42 = vadd.f32 %v152_v41, %v146_v40 }
 0x1c5   :  { %v171_v43 = vpack.c.bf16 %v153_v42, %v153_v42 }
 0x1c7   :  { %355 = vmatmul.mubr.bf16.vlgmr.msra.gmra.mrb[0].mxu1 %v171_v43 }
 0x29a   :  { %v258_v46 = vpop.f32.mrb[0].mxu1 }
 0x29b   :  { %v259_v47 = vadd.f32 %v258_v46, %v175_v45  ;;  %v356_v48 = vpop.f32.mrb[1].mxu1 }
 0x29c   :  { %v261_v49 = vpop.f32.mrb[2].mxu1 }
 0x29d   :  { %v264_v50 = vmax.f32 %v259_v47, 0.0  ;;  %v357_v51 = vpop.f32.mrb[3].mxu1 }
 0x29f   :  { %265 = vadd.xlane.f32.xlu1 %v264_v50  ;;  %v267_v52 = vmul.f32 %v264_v50, %v264_v50 }
 0x2a3   :  { %268 = vadd.xlane.f32.xlu1 %v267_v52 }
 0x32c   :  { %v266_v53 = vpop.xlane.xlu1 %265 }
 0x32d   :  { %v270_v54 = vmul.f32 0.03125, %v266_v53 }
 0x32f   :  { %v272_v56 = vmul.f32 %v270_v54, %v270_v54 }
 0x330   :  { %v269_v55 = vpop.xlane.xlu1 %268 }
 0x331   :  { %v271_v57 = vmul.f32 0.03125, %v269_v55 }
 0x333   :  { %v273_v58 = vsub.f32 %v271_v57, %v272_v56 }
 0x335   :  { %v274_v59 = vmax.f32 %v273_v58, 0.0 }
 0x337   :  { %v275_v60 = vadd.f32 1e-05, %v274_v59 }
 0x339   :  { %378 = vrsqrt.f32 %v275_v60 }
 0x343   :  { %v379_v62 = vpop.eup %378 }
 0x344   :  { %v281_v0 = vmul.f32 %v379_v62, %v280_v61 }
 0x346   :  { %v283_v1 = vmul.f32 %v281_v0, %v270_v54  ;;  %v282_v2 = vmul.f32 %v281_v0, %v264_v50 }
 0x348   :  { %v288_v3 = vsub.f32 %v287_v63, %v283_v1 }
 0x34a   :  { %v289_v4 = vadd.f32 %v288_v3, %v282_v2 }
 0x34c   :  { %290 = vst [vmem:[#allocation8] sm:$0xff] %v289_v4 }
 0x34d   :  { %457 = shalt.err (!%p454_p0)
}
 0x34e   :  { %s458_s10 = scalar_lea.hbm %s582_s5, 128 }
 0x34f   :  { %p459_p1 = scmp.ne.s32.totalorder %s582_s5, %s458_s10  ;;  %p462_p2 = scmp.lt.u32.totalorder %s458_s10, %s582_s5 }
 0x351   :  { %p464_p3 = pnand %p462_p2, %p459_p1 }
 0x353   :  { %467 = shalt.err (!%p464_p3)
}
 0x354   :  { %300 = dma.vmem_to_hbm [thread:$0]  %s298_s6, 128, %s582_s5, [#allocation4]  }
 0x355   :  { %472 = dma.done.wait [#allocation4], 128  }
 0x356   :  { %473 = vsyncadd [#allocation4], 4294967168 }
 0x357   :  { %304 = vsyncpa [#allocation3], 1 }
 0x358   :  { %305 = vsyncpa [#allocation6], 1 }
 0x359   :  { %306 = vsyncpa [#allocation4], 1 }

// kernel: _mlp_forward_impl.1
= control target key start
LH: loop header
LB: loop body
LE: loop exit
PB: predicated region body
PF: predicated region fallthrough
CT: control target
= control target key end

     0   :  { %10 = vsyncpa [#allocation3], 0  ;;  %s577_s0 = inlined_call_operand.hbm [shape: f32[8,32], index: 0, kind: input, shape index: {}]   ;;  %s578_s1 = inlined_call_operand.hbm [shape: bf16[32,128], index: 1, kind: input, shape index: {}]   ;;  %s579_s2 = inlined_call_operand.vmem [shape: f32[3,128], index: 2, kind: input, shape index: {}]   ;;  %s580_s3 = inlined_call_operand.hbm [shape: bf16[128,128], index: 3, kind: input, shape index: {}]   ;;  %s581_s4 = inlined_call_operand.vmem [shape: f32[3,128], index: 4, kind: input, shape index: {}]   ;;  %s582_s5 = inlined_call_operand.hbm [shape: f32[8,128], index: 5, kind: output, shape index: {}]  }
   0x1   :  { %11 = vsyncpa [#allocation6], 0 }
   0x2   :  { %12 = vsyncpa [#allocation4], 0  ;;  %s474_s18 = smov [#allocation5]   ;;  %s380_s22 = scalar_lea.hbm %s578_s1, 256 }
   0x3   :  { %s28_s19 = sshll.u32 %s474_s18, 4  ;;  %p381_p0 = scmp.ne.s32.totalorder %s578_s1, %s380_s22  ;;  %s29_s19 = int_to_ptr.vmem [resolvable:$true] %s28_s19 }
   0x4   :  { %p384_p1 = scmp.lt.u32.totalorder %s380_s22, %s578_s1 }
   0x6   :  { %p386_p2 = pnand %p384_p1, %p381_p0 }
   0x8   :  { %389 = shalt.err (!%p386_p2)
}
   0x9   :  { %s390_s27 = scalar_lea.vmem %s29_s19, 256  ;;  %p395_p4 = scmp.lt.s32.totalorder %s29_s19, %s29_s19 }
   0xa   :  { %p391_p3 = scmp.ne.s32.totalorder %s29_s19, %s390_s27  ;;  %p396_p5 = scmp.lt.s32.totalorder %s390_s27, %s390_s27 }
   0xc   :  { %p397_p6 = por %p396_p5, %p395_p4 }
   0xe   :  { %p398_p7 = pnand %p397_p6, %p391_p3 }
  0x10   :  { %401 = shalt.err (!%p398_p7)
}
  0x11   :  { %s475_s28 = smov 64   ;;  %s476_s29 = smov 4  }
  0x12   :  { %34 = dma.hbm_to_vmem [thread:$0]  %s578_s1, 256, %s29_s19, [#allocation6], %s475_s28, %s475_s28, %s476_s29  }
  0x13   :  { %s477_s7 = smov [#allocation2]   ;;  %s478_s9 = smov [#allocation7]  }
  0x14   :  { %s19_s8 = sshll.u32 %s477_s7, 4  ;;  %s42_s10 = sshll.u32 %s478_s9, 4  ;;  %s20_s8 = int_to_ptr.vmem [resolvable:$true] %s19_s8  ;;  %s43_s10 = int_to_ptr.vmem [resolvable:$true] %s42_s10 }
  0x15   :  { %s402_s13 = scalar_lea.hbm %s577_s0, 128 }
  0x16   :  { %p403_p8 = scmp.ne.s32.totalorder %s577_s0, %s402_s13  ;;  %p406_p9 = scmp.lt.u32.totalorder %s402_s13, %s577_s0 }
  0x18   :  { %p408_p10 = pnand %p406_p9, %p403_p8 }
  0x1a   :  { %411 = shalt.err (!%p408_p10)
}
  0x1b   :  { %s412_s1 = scalar_lea.vmem %s20_s8, 128  ;;  %p417_p12 = scmp.lt.s32.totalorder %s20_s8, %s20_s8 }
  0x1c   :  { %p413_p11 = scmp.ne.s32.totalorder %s20_s8, %s412_s1  ;;  %p418_p13 = scmp.lt.s32.totalorder %s412_s1, %s412_s1 }
  0x1e   :  { %p419_p0 = por %p418_p13, %p417_p12 }
  0x20   :  { %p420_p1 = pnand %p419_p0, %p413_p11 }
  0x22   :  { %423 = shalt.err (!%p420_p1)
}
  0x23   :  { %22 = dma.hbm_to_vmem [thread:$0]  %s577_s0, 128, %s20_s8, [#allocation3]  }
  0x24   :  { %s424_s22 = scalar_lea.hbm %s580_s3, 1024 }
  0x25   :  { %p425_p2 = scmp.ne.s32.totalorder %s580_s3, %s424_s22  ;;  %p428_p3 = scmp.lt.u32.totalorder %s424_s22, %s580_s3 }
  0x27   :  { %p430_p4 = pnand %p428_p3, %p425_p2 }
  0x29   :  { %433 = shalt.err (!%p430_p4)
}
  0x2a   :  { %s434_s27 = scalar_lea.vmem %s43_s10, 1024  ;;  %p439_p6 = scmp.lt.s32.totalorder %s43_s10, %s43_s10 }
  0x2b   :  { %p435_p5 = scmp.ne.s32.totalorder %s43_s10, %s434_s27  ;;  %p440_p7 = scmp.lt.s32.totalorder %s434_s27, %s434_s27 }
  0x2d   :  { %p441_p8 = por %p440_p7, %p439_p6 }
  0x2f   :  { %p442_p9 = pnand %p441_p8, %p435_p5 }
  0x31   :  { %445 = shalt.err (!%p442_p9)
}
  0x32   :  { %48 = dma.hbm_to_vmem [thread:$0]  %s580_s3, 1024, %s43_s10, [#allocation6], %s475_s28, %s475_s28, %s476_s29  }
  0x33   :  { %468 = dma.done.wait [#allocation3], 128  }
  0x34   :  { %469 = vsyncadd [#allocation3], 4294967168 }
  0x35   :  { %470 = dma.done.wait [#allocation6], 1280  }
  0x36   :  { %471 = vsyncadd [#allocation6], 4294966016  ;;  %v479_v0 = vmov 0.0   ;;  %vm480_vm0 = vmmov 0   ;;  %v366_v1 = vld [vmem:[#allocation5] sm:$0xff]   ;;  %v367_v2 = vld [vmem:[#allocation5 + $0x8] sm:$0xff]   ;;  %v68_v5 = vlaneseq }
  0x37   :  { %330 = vmatprep.subr.bf16.mxu0 %v479_v0  ;;  %334 = vmatprep.mubr.msk.bf16.mxu0 %vm480_vm0, %v479_v0  ;;  %v61_v3 = vld [vmem:[#allocation2] sm:$0xff]  ;;  %vm84_vm1 = vcmask 261120   ;;  %v368_v17 = vld [vmem:[#allocation7] sm:$0xff]   ;;  %v370_v19 = vld [vmem:[#allocation7 + $0x10] sm:$0xff]  }
  0x38   :  { %338 = vmatprep.subr.bf16.mxu1 %v479_v0  ;;  %354 = vmatprep.mubr.msk.bf16.mxu1 %vm480_vm0, %v479_v0  ;;  %v67_v4 = vpack.c.bf16 %v61_v3, %v61_v3  ;;  %v554_v6 = vshrl.u32 %v68_v5, 7  ;;  %v66_v8 = vld [vmem:[%s579_s2] sm:$0x7]  ;;  %v371_v20 = vld [vmem:[#allocation7 + $0x18] sm:$0xff]   ;;  %v372_v21 = vld [vmem:[#allocation7 + $0x20] sm:$0xff]  }
  0x39   :  { %331 = vmatpush3.bf16.msra.mxu0 %v366_v1  ;;  %339 = vmatpush3.bf16.msra.mxu1 %v368_v17  ;;  %v369_v18 = vld [vmem:[#allocation7 + $0x8] sm:$0xff]   ;;  %v374_v23 = vld [vmem:[#allocation7 + $0x30] sm:$0xff]   ;;  %v375_v24 = vld [vmem:[#allocation7 + $0x38] sm:$0xff]  }
  0x3a   :  { %332 = vmatprep.subr.bf16.mxu0 %v479_v0  ;;  %v70_v7 = vsub.s32 0, %v554_v6  ;;  %340 = vmatprep.subr.bf16.mxu1 %v479_v0  ;;  %v373_v22 = vld [vmem:[#allocation7 + $0x28] sm:$0xff]   ;;  %v143_v33 = vsub.s32 1, %v554_v6  ;;  %v150_v35 = vsub.s32 2, %v554_v6 }
  0x3b   :  { %v170_v44 = vld [vmem:[%s581_s4] sm:$0x7]  ;;  %s481_s4 = smov [#allocation8]  }
  0x3c   :  { %v71_v9 = vrot.slane %v66_v8, %v70_v7  ;;  %v144_v34 = vrot.slane %v66_v8, %v143_v33  ;;  %v151_v37 = vrot.slane %v66_v8, %v150_v35  ;;  %v175_v45 = vrot.slane %v170_v44, %v70_v7  ;;  %s297_s6 = sshll.u32 %s481_s4, 4  ;;  %s298_s6 = int_to_ptr.vmem [resolvable:$true] %s297_s6 }
  0x3d   :  { %333 = vmatpush3.bf16.msra.mxu0 %v367_v2  ;;  %341 = vmatpush3.bf16.msra.mxu1 %v369_v18  ;;  %v280_v61 = vrot.slane %v170_v44, %v143_v33  ;;  %v287_v63 = vrot.slane %v170_v44, %v150_v35  ;;  %s446_s7 = scalar_lea.vmem %s298_s6, 128  ;;  %p451_p11 = scmp.lt.s32.totalorder %s298_s6, %s298_s6 }
  0x3e   :  { %342 = vmatprep.subr.bf16.mxu1 %v479_v0  ;;  %p447_p10 = scmp.ne.s32.totalorder %s298_s6, %s446_s7  ;;  %p452_p12 = scmp.lt.s32.totalorder %s446_s7, %s446_s7 }
  0x40   :  { %335 = vmatmul.mubr.msk.bf16.vlgmr.msra.gmra.mrb[0].mxu0 %vm84_vm1, %v67_v4  ;;  %p453_p13 = por %p452_p12, %p451_p11 }
  0x41   :  { %343 = vmatpush3.bf16.msra.mxu1 %v370_v19 }
  0x42   :  { %344 = vmatprep.subr.bf16.mxu1 %v479_v0  ;;  %p454_p0 = pnand %p453_p13, %p447_p10 }
  0x45   :  { %345 = vmatpush3.bf16.msra.mxu1 %v371_v20 }
  0x46   :  { %346 = vmatprep.subr.bf16.mxu1 %v479_v0 }
  0x49   :  { %347 = vmatpush3.bf16.msra.mxu1 %v372_v21 }
  0x4a   :  { %348 = vmatprep.subr.bf16.mxu1 %v479_v0 }
  0x4d   :  { %349 = vmatpush3.bf16.msra.mxu1 %v373_v22 }
  0x4e   :  { %350 = vmatprep.subr.bf16.mxu1 %v479_v0 }
  0x51   :  { %351 = vmatpush3.bf16.msra.mxu1 %v374_v23 }
  0x52   :  { %352 = vmatprep.subr.bf16.mxu1 %v479_v0 }
  0x55   :  { %353 = vmatpush3.bf16.msra.mxu1 %v375_v24 }
 0x113   :  { %v122_v10 = vpop.f32.mrb[0].mxu0 }
 0x114   :  { %v123_v11 = vadd.f32 %v122_v10, %v71_v9  ;;  %v336_v12 = vpop.f32.mrb[1].mxu0 }
 0x115   :  { %v125_v13 = vpop.f32.mrb[2].mxu0 }
 0x116   :  { %v128_v14 = vmax.f32 %v123_v11, 0.0  ;;  %v337_v15 = vpop.f32.mrb[3].mxu0 }
 0x118   :  { %129 = vadd.xlane.f32.xlu0 %v128_v14  ;;  %v131_v16 = vmul.f32 %v128_v14, %v128_v14 }
 0x11c   :  { %132 = vadd.xlane.f32.xlu0 %v131_v16 }
 0x1a5   :  { %v130_v25 = vpop.xlane.xlu0 %129 }
 0x1a6   :  { %v134_v26 = vmul.f32 0.015625, %v130_v25 }
 0x1a8   :  { %v136_v28 = vmul.f32 %v134_v26, %v134_v26 }
 0x1a9   :  { %v133_v27 = vpop.xlane.xlu0 %132 }
 0x1aa   :  { %v135_v29 = vmul.f32 0.015625, %v133_v27 }
 0x1ac   :  { %v137_v30 = vsub.f32 %v135_v29, %v136_v28 }
 0x1ae   :  { %v138_v31 = vmax.f32 %v137_v30, 0.0 }
 0x1b0   :  { %v139_v32 = vadd.f32 1e-05, %v138_v31 }
 0x1b2   :  { %376 = vrsqrt.f32 %v139_v32 }
 0x1bc   :  { %v377_v36 = vpop.eup %376 }
 0x1bd   :  { %v145_v38 = vmul.f32 %v377_v36, %v144_v34 }
 0x1bf   :  { %v147_v39 = vmul.f32 %v145_v38, %v134_v26  ;;  %v146_v40 = vmul.f32 %v145_v38, %v128_v14 }
 0x1c1   :  { %v152_v41 = vsub.f32 %v151_v37, %v147_v39 }
 0x1c3   :  { %v153_v42 = vadd.f32 %v152_v41, %v146_v40 }
 0x1c5   :  { %v171_v43 = vpack.c.bf16 %v153_v42, %v153_v42 }
 0x1c7   :  { %355 = vmatmul.mubr.bf16.vlgmr.msra.gmra.mrb[0].mxu1 %v171_v43 }
 0x29a   :  { %v258_v46 = vpop.f32.mrb[0].mxu1 }
 0x29b   :  { %v259_v47 = vadd.f32 %v258_v46, %v175_v45  ;;  %v356_v48 = vpop.f32.mrb[1].mxu1 }
 0x29c   :  { %v261_v49 = vpop.f32.mrb[2].mxu1 }
 0x29d   :  { %v264_v50 = vmax.f32 %v259_v47, 0.0  ;;  %v357_v51 = vpop.f32.mrb[3].mxu1 }
 0x29f   :  { %265 = vadd.xlane.f32.xlu1 %v264_v50  ;;  %v267_v52 = vmul.f32 %v264_v50, %v264_v50 }
 0x2a3   :  { %268 = vadd.xlane.f32.xlu1 %v267_v52 }
 0x32c   :  { %v266_v53 = vpop.xlane.xlu1 %265 }
 0x32d   :  { %v270_v54 = vmul.f32 0.03125, %v266_v53 }
 0x32f   :  { %v272_v56 = vmul.f32 %v270_v54, %v270_v54 }
 0x330   :  { %v269_v55 = vpop.xlane.xlu1 %268 }
 0x331   :  { %v271_v57 = vmul.f32 0.03125, %v269_v55 }
 0x333   :  { %v273_v58 = vsub.f32 %v271_v57, %v272_v56 }
 0x335   :  { %v274_v59 = vmax.f32 %v273_v58, 0.0 }
 0x337   :  { %v275_v60 = vadd.f32 1e-05, %v274_v59 }
 0x339   :  { %378 = vrsqrt.f32 %v275_v60 }
 0x343   :  { %v379_v62 = vpop.eup %378 }
 0x344   :  { %v281_v0 = vmul.f32 %v379_v62, %v280_v61 }
 0x346   :  { %v283_v1 = vmul.f32 %v281_v0, %v270_v54  ;;  %v282_v2 = vmul.f32 %v281_v0, %v264_v50 }
 0x348   :  { %v288_v3 = vsub.f32 %v287_v63, %v283_v1 }
 0x34a   :  { %v289_v4 = vadd.f32 %v288_v3, %v282_v2 }
 0x34c   :  { %290 = vst [vmem:[#allocation8] sm:$0xff] %v289_v4 }
 0x34d   :  { %457 = shalt.err (!%p454_p0)
}
 0x34e   :  { %s458_s10 = scalar_lea.hbm %s582_s5, 128 }
 0x34f   :  { %p459_p1 = scmp.ne.s32.totalorder %s582_s5, %s458_s10  ;;  %p462_p2 = scmp.lt.u32.totalorder %s458_s10, %s582_s5 }
 0x351   :  { %p464_p3 = pnand %p462_p2, %p459_p1 }
 0x353   :  { %467 = shalt.err (!%p464_p3)
}
 0x354   :  { %300 = dma.vmem_to_hbm [thread:$0]  %s298_s6, 128, %s582_s5, [#allocation4]  }
 0x355   :  { %472 = dma.done.wait [#allocation4], 128  }
 0x356   :  { %473 = vsyncadd [#allocation4], 4294967168 }
 0x357   :  { %304 = vsyncpa [#allocation3], 1 }
 0x358   :  { %305 = vsyncpa [#allocation6], 1 }
 0x359   :  { %306 = vsyncpa [#allocation4], 1 }

</bundles_post_ra>
